<compile_context>
chip_gen: v5e
topology: v5e:2x2
jax: 0.10.0
libtpu: 0.0.40
codegen_flags: <defaults>
</compile_context>

<pallas_src>
import functools
import math

import jax
import jax.numpy as jnp
from jax.experimental import pallas as pl
from jax.experimental.pallas import tpu as pltpu


# ----------------------------- config (small) -----------------------------
CFG = dict(
    emb_dim=32,
    context_length=8,
    n_heads=4,
    drop_rate=0.0,   # dropout is identity in this kernel
    qkv_bias=False,
)
BATCH = 2
SEQ = CFG["context_length"]
EMB = CFG["emb_dim"]
HEADS = CFG["n_heads"]
HEAD_DIM = EMB // HEADS
HIDDEN = 4 * EMB
EPS = 1e-5
_GELU_C = math.sqrt(2.0 / math.pi)


# ------------------------------ Pallas kernel ------------------------------
def _layernorm(v, scale, shift):
    mean = jnp.mean(v, axis=-1, keepdims=True)
    cent = v - mean
    var = jnp.mean(cent * cent, axis=-1, keepdims=True)      # unbiased=False
    return cent * jax.lax.rsqrt(var + EPS) * scale + shift


def _gelu_tanh(x):
    return 0.5 * x * (1.0 + jnp.tanh(_GELU_C * (x + 0.044715 * x * x * x)))


def _transformer_block_kernel(
    x_ref,        # (rows, D)      activations for this grid step (rows = seqs*T)
    wqkv_ref,     # (3H, D, Hd)    per-head Wq/Wk/Wv stacked on the leading axis
    woh_ref,      # (H, Hd, D)     per-head output projection
    w1_ref,       # (D, HIDDEN)
    b1_ref,       # (1, HIDDEN)
    w2_ref,       # (HIDDEN, D)
    vec_ref,      # (6, D)         ln1_s, ln1_b, ln2_s, ln2_b, bo, b2
    o_ref,        # (rows, D)
    *, seqs_per_block, seq_len, n_heads, head_dim,
):
    T, H, Hd = seq_len, n_heads, head_dim

    x = x_ref[...]                                   # (rows, D) f32
    vecs = vec_ref[...]                              # (6, D)
    ln1_s, ln1_b = vecs[0:1], vecs[1:2]
    ln2_s, ln2_b = vecs[2:3], vecs[3:4]
    bo, b2 = vecs[4:5], vecs[5:6]

    # ---- LayerNorm 1 (all sequences at once) ----
    xn = _layernorm(x, ln1_s, ln1_b)

    # Causal additive bias built once, reused across all sequences and heads.
    row = jax.lax.broadcasted_iota(jnp.int32, (T, T), 0)
    col = jax.lax.broadcasted_iota(jnp.int32, (T, T), 1)
    bias = jnp.where(col <= row, 0.0, -1e9).astype(jnp.float32)   # (T, T)

    w_all = wqkv_ref[...]                            # (3H, D, Hd)
    wo_h = woh_ref[...]                              # (H, Hd, D)
    sm_scale = 1.0 / math.sqrt(float(Hd))

    attn_parts = []
    for s in range(seqs_per_block):                  # static unroll (<= batch)
        xn_s = xn[s * T:(s + 1) * T, :]              # (T, D) sublane slice
        xb = jnp.broadcast_to(xn_s[None], (3 * H, T, xn_s.shape[-1]))
        # One head-batched matmul produces q, k, v for every head.
        qkv = jnp.einsum("htd,hdk->htk", xb, w_all,
                         preferred_element_type=jnp.float32)      # (3H, T, Hd)
        q, k, v = qkv[0:H], qkv[H:2 * H], qkv[2 * H:3 * H]        # (H, T, Hd)

        sco = jnp.einsum("htd,hsd->hts", q, k,
                         preferred_element_type=jnp.float32) * sm_scale + bias[None]
        m = jnp.max(sco, axis=-1, keepdims=True)
        p = jnp.exp(sco - m)
        denom = jnp.sum(p, axis=-1, keepdims=True)
        p = p * pl.reciprocal(denom, approx=True)                  # EUP divide

        ctx = jnp.einsum("hts,hsd->htd", p, v,
                         preferred_element_type=jnp.float32)       # (H, T, Hd)
        # Output projection per head, accumulated over heads (no lane concat).
        proj = jnp.einsum("htd,hde->hte", ctx, wo_h,
                          preferred_element_type=jnp.float32)      # (H, T, D)
        attn_parts.append(jnp.sum(proj, axis=0))                   # (T, D)

    attn = attn_parts[0] if len(attn_parts) == 1 else jnp.concatenate(attn_parts, axis=0)
    attn = attn + bo
    # dropout(attn) == identity
    x1 = x + attn

    # ---- LayerNorm 2 + FeedForward (Linear -> GELU(tanh) -> Linear) ----
    xn2 = _layernorm(x1, ln2_s, ln2_b)
    h1 = jnp.dot(xn2, w1_ref[...], preferred_element_type=jnp.float32) + b1_ref[...]
    g = _gelu_tanh(h1)
    ff = jnp.dot(g, w2_ref[...], preferred_element_type=jnp.float32) + b2
    # dropout(ff) == identity; single store of the whole block.
    o_ref[...] = (x1 + ff).astype(o_ref.dtype)


# ------------------------------- wrapper -----------------------------------
@functools.partial(jax.jit, static_argnames=("batch_blocks",))
def transformer_block(x, params, *, batch_blocks=1):
    """batch_blocks=1: whole batch in one grid step (best on v5e/v6e, 1 TC).
    batch_blocks=BATCH: one batch element per 'parallel' grid step (use on v7x, 2 TCs)."""
    B, T, D = x.shape
    H = HEADS
    Hd = D // H
    HID = 4 * D
    assert B % batch_blocks == 0
    seqs_per_block = B // batch_blocks
    rows = seqs_per_block * T

    x2d = x.reshape(B * T, D)

    # ---- pack parameters outside the kernel (free XLA reshapes) ----
    def per_head_in(w):                               # (D, D) -> (H, D, Hd)
        return w.reshape(D, H, Hd).transpose(1, 0, 2)

    wqkv = jnp.concatenate([per_head_in(params["wq"]),
                            per_head_in(params["wk"]),
                            per_head_in(params["wv"])], axis=0)     # (3H, D, Hd)
    wo_h = params["wo"].reshape(H, Hd, D)                           # (H, Hd, D)
    vecs = jnp.stack([params["ln1_scale"], params["ln1_shift"],
                      params["ln2_scale"], params["ln2_shift"],
                      params["bo"], params["b2"]], axis=0)          # (6, D)
    b1 = params["b1"].reshape(1, HID)

    kernel = functools.partial(
        _transformer_block_kernel,
        seqs_per_block=seqs_per_block, seq_len=T, n_heads=H, head_dim=Hd)

    out2d = pl.pallas_call(
        kernel,
        out_shape=jax.ShapeDtypeStruct((B * T, D), x.dtype),
        grid_spec=pltpu.PrefetchScalarGridSpec(
            num_scalar_prefetch=0,
            grid=(batch_blocks,),
            in_specs=[
                pl.BlockSpec((rows, D), lambda i: (i, 0)),          # activations
                pl.BlockSpec((3 * H, D, Hd), lambda i: (0, 0, 0)),  # Wq/Wk/Wv (per head)
                pl.BlockSpec((H, Hd, D), lambda i: (0, 0, 0)),      # Wo (per head)
                pl.BlockSpec((D, HID), lambda i: (0, 0)),           # W1
                pl.BlockSpec((1, HID), lambda i: (0, 0)),           # b1
                pl.BlockSpec((HID, D), lambda i: (0, 0)),           # W2
                pl.BlockSpec((6, D), lambda i: (0, 0)),             # packed vectors
            ],
            out_specs=pl.BlockSpec((rows, D), lambda i: (i, 0)),
        ),
        compiler_params=pltpu.CompilerParams(
            dimension_semantics=("parallel",)),
    )(x2d, wqkv, wo_h, params["w1"], b1, params["w2"], vecs)

    return out2d.reshape(B, T, D)


# ---------------------- pure-JAX reference (for check) ----------------------
def reference_block(x, p):
    def ln(v, s, b):
        m = jnp.mean(v, axis=-1, keepdims=True)
        var = jnp.mean((v - m) ** 2, axis=-1, keepdims=True)
        return (v - m) / jnp.sqrt(var + EPS) * s + b

    B, T, D = x.shape
    H, Hd = HEADS, D // HEADS
    xn = ln(x, p["ln1_scale"], p["ln1_shift"])
    q = xn @ p["wq"]; k = xn @ p["wk"]; v = xn @ p["wv"]
    q = q.reshape(B, T, H, Hd).transpose(0, 2, 1, 3)
    k = k.reshape(B, T, H, Hd).transpose(0, 2, 1, 3)
    v = v.reshape(B, T, H, Hd).transpose(0, 2, 1, 3)
    s = jnp.einsum("bhtd,bhsd->bhts", q, k) / jnp.sqrt(jnp.float32(Hd))
    mask = jnp.triu(jnp.ones((T, T), bool), k=1)
    s = jnp.where(mask[None, None], -jnp.inf, s)
    w = jax.nn.softmax(s, axis=-1)
    ctx = jnp.einsum("bhts,bhsd->bthd", w, v).reshape(B, T, D)
    attn = ctx @ p["wo"] + p["bo"]
    x1 = x + attn
    xn2 = ln(x1, p["ln2_scale"], p["ln2_shift"])
    h = xn2 @ p["w1"] + p["b1"]
    c = jnp.sqrt(2.0 / jnp.pi)
    g = 0.5 * h * (1.0 + jnp.tanh(c * (h + 0.044715 * h ** 3)))
    ff = g @ p["w2"] + p["b2"]
    return x1 + ff


# ----------------------------------- main -----------------------------------
if __name__ == "__main__":
    key = jax.random.PRNGKey(0)
    ks = jax.random.split(key, 10)

    params = {
        "ln1_scale": jnp.ones((EMB,), jnp.float32),
        "ln1_shift": jnp.zeros((EMB,), jnp.float32),
        "ln2_scale": jnp.ones((EMB,), jnp.float32),
        "ln2_shift": jnp.zeros((EMB,), jnp.float32),
        "wq": 0.02 * jax.random.normal(ks[0], (EMB, EMB), jnp.float32),
        "wk": 0.02 * jax.random.normal(ks[1], (EMB, EMB), jnp.float32),
        "wv": 0.02 * jax.random.normal(ks[2], (EMB, EMB), jnp.float32),
        "wo": 0.02 * jax.random.normal(ks[3], (EMB, EMB), jnp.float32),
        "bo": 0.02 * jax.random.normal(ks[4], (EMB,), jnp.float32),
        "w1": 0.02 * jax.random.normal(ks[5], (EMB, HIDDEN), jnp.float32),
        "b1": 0.02 * jax.random.normal(ks[6], (HIDDEN,), jnp.float32),
        "w2": 0.02 * jax.random.normal(ks[7], (HIDDEN, EMB), jnp.float32),
        "b2": 0.02 * jax.random.normal(ks[8], (EMB,), jnp.float32),
    }

    x = jax.random.normal(ks[9], (BATCH, SEQ, EMB), jnp.float32)

    # Collapsed grid (single step, whole batch) — preferred on v5e/v6e.
    out1 = jax.block_until_ready(transformer_block(x, params, batch_blocks=1))
    # Batch-parallel grid (one element per step) — preferred on v7x (2 TCs).
    out2 = jax.block_until_ready(transformer_block(x, params, batch_blocks=BATCH))

    ref = reference_block(x, params)
    assert out1.shape == (BATCH, SEQ, EMB)
    assert jnp.max(jnp.abs(out1 - ref)) < 1e-3
    assert jnp.max(jnp.abs(out2 - ref)) < 1e-3

    print("KERNEL_OK")
</pallas_src>

<mosaic_0001>
module attributes {stable_mosaic.version = 11 : i64} {
  func.func @_transformer_block_kernel(%arg0: i32, %arg1: memref<16x32xf32, #tpu.memory_space<vmem>>, %arg2: memref<12x32x8xf32, #tpu.memory_space<vmem>>, %arg3: memref<4x8x32xf32, #tpu.memory_space<vmem>>, %arg4: memref<32x128xf32, #tpu.memory_space<vmem>>, %arg5: memref<1x128xf32, #tpu.memory_space<vmem>>, %arg6: memref<128x32xf32, #tpu.memory_space<vmem>>, %arg7: memref<6x32xf32, #tpu.memory_space<vmem>>, %arg8: memref<16x32xf32, #tpu.memory_space<vmem>>) attributes {dimension_semantics = [#tpu.dimension_semantics<parallel>], iteration_bounds = array<i64: 1>, scalar_prefetch = 0 : i64, scratch_operands = 0 : i64, tpu.core_type = #tpu.core_type<tc>, window_params = [{transform_indices = @transform_0, window_bounds = array<i64: 16, 32>}, {pipeline_mode = #tpu.pipeline_mode<synchronous>, transform_indices = @transform_1, window_bounds = array<i64: 12, 32, 8>}, {pipeline_mode = #tpu.pipeline_mode<synchronous>, transform_indices = @transform_2, window_bounds = array<i64: 4, 8, 32>}, {pipeline_mode = #tpu.pipeline_mode<synchronous>, transform_indices = @transform_3, window_bounds = array<i64: 32, 128>}, {pipeline_mode = #tpu.pipeline_mode<synchronous>, transform_indices = @transform_4, window_bounds = array<i64: 1, 128>}, {pipeline_mode = #tpu.pipeline_mode<synchronous>, transform_indices = @transform_5, window_bounds = array<i64: 128, 32>}, {pipeline_mode = #tpu.pipeline_mode<synchronous>, transform_indices = @transform_6, window_bounds = array<i64: 6, 32>}, {transform_indices = @transform_7, window_bounds = array<i64: 16, 32>}]} {
    %c0 = arith.constant 0 : index
    %c0_0 = arith.constant 0 : index
    %0 = vector.load %arg1[%c0, %c0_0] : memref<16x32xf32, #tpu.memory_space<vmem>>, vector<16x32xf32>
    %c0_1 = arith.constant 0 : index
    %c0_2 = arith.constant 0 : index
    %1 = vector.load %arg7[%c0_1, %c0_2] : memref<6x32xf32, #tpu.memory_space<vmem>>, vector<6x32xf32>
    %2 = vector.extract_strided_slice %1 {offsets = [0, 0], sizes = [1, 32], strides = [1, 1]} : vector<6x32xf32> to vector<1x32xf32>
    %3 = vector.extract_strided_slice %1 {offsets = [1, 0], sizes = [1, 32], strides = [1, 1]} : vector<6x32xf32> to vector<1x32xf32>
    %4 = vector.extract_strided_slice %1 {offsets = [2, 0], sizes = [1, 32], strides = [1, 1]} : vector<6x32xf32> to vector<1x32xf32>
    %5 = vector.extract_strided_slice %1 {offsets = [3, 0], sizes = [1, 32], strides = [1, 1]} : vector<6x32xf32> to vector<1x32xf32>
    %6 = vector.extract_strided_slice %1 {offsets = [4, 0], sizes = [1, 32], strides = [1, 1]} : vector<6x32xf32> to vector<1x32xf32>
    %7 = vector.extract_strided_slice %1 {offsets = [5, 0], sizes = [1, 32], strides = [1, 1]} : vector<6x32xf32> to vector<1x32xf32>
    %cst = arith.constant dense<0.000000e+00> : vector<16xf32>
    %8 = vector.multi_reduction <add>, %0, %cst [1] : vector<16x32xf32> to vector<16xf32>
    %9 = vector.shape_cast %8 : vector<16xf32> to vector<16x1xf32>
    %cst_3 = arith.constant 3.200000e+01 : f32
    %10 = vector.broadcast %cst_3 : f32 to vector<16x1xf32>
    %11 = arith.divf %9, %10 : vector<16x1xf32>
    %12 = vector.broadcast %11 : vector<16x1xf32> to vector<16x32xf32>
    %13 = arith.subf %0, %12 : vector<16x32xf32>
    %14 = arith.mulf %13, %13 : vector<16x32xf32>
    %cst_4 = arith.constant dense<0.000000e+00> : vector<16xf32>
    %15 = vector.multi_reduction <add>, %14, %cst_4 [1] : vector<16x32xf32> to vector<16xf32>
    %16 = vector.shape_cast %15 : vector<16xf32> to vector<16x1xf32>
    %cst_5 = arith.constant 3.200000e+01 : f32
    %17 = vector.broadcast %cst_5 : f32 to vector<16x1xf32>
    %18 = arith.divf %16, %17 : vector<16x1xf32>
    %cst_6 = arith.constant 9.99999974E-6 : f32
    %19 = vector.broadcast %cst_6 : f32 to vector<16x1xf32>
    %20 = arith.addf %18, %19 : vector<16x1xf32>
    %21 = math.rsqrt %20 : vector<16x1xf32>
    %22 = vector.broadcast %21 : vector<16x1xf32> to vector<16x32xf32>
    %23 = arith.mulf %13, %22 : vector<16x32xf32>
    %24 = vector.broadcast %2 : vector<1x32xf32> to vector<16x32xf32>
    %25 = arith.mulf %23, %24 : vector<16x32xf32>
    %26 = vector.broadcast %3 : vector<1x32xf32> to vector<16x32xf32>
    %27 = arith.addf %25, %26 : vector<16x32xf32>
    %28 = tpu.iota {dimensions = array<i32: 0>} : vector<8x8xi32>
    %29 = tpu.iota {dimensions = array<i32: 1>} : vector<8x8xi32>
    %30 = arith.cmpi sle, %29, %28 : vector<8x8xi32>
    %cst_7 = arith.constant 0.000000e+00 : f32
    %cst_8 = arith.constant -1.000000e+09 : f32
    %31 = vector.broadcast %cst_7 : f32 to vector<8x8xf32>
    %32 = vector.broadcast %cst_8 : f32 to vector<8x8xf32>
    %33 = arith.select %30, %31, %32 : vector<8x8xi1>, vector<8x8xf32>
    %c0_9 = arith.constant 0 : index
    %c0_10 = arith.constant 0 : index
    %c0_11 = arith.constant 0 : index
    %34 = vector.load %arg2[%c0_9, %c0_10, %c0_11] : memref<12x32x8xf32, #tpu.memory_space<vmem>>, vector<12x32x8xf32>
    %c0_12 = arith.constant 0 : index
    %c0_13 = arith.constant 0 : index
    %c0_14 = arith.constant 0 : index
    %35 = vector.load %arg3[%c0_12, %c0_13, %c0_14] : memref<4x8x32xf32, #tpu.memory_space<vmem>>, vector<4x8x32xf32>
    %36 = vector.extract_strided_slice %27 {offsets = [0, 0], sizes = [8, 32], strides = [1, 1]} : vector<16x32xf32> to vector<8x32xf32>
    %37 = vector.shape_cast %36 : vector<8x32xf32> to vector<1x8x32xf32>
    %38 = vector.shape_cast %37 : vector<1x8x32xf32> to vector<1x8x32xf32>
    %39 = vector.broadcast %38 : vector<1x8x32xf32> to vector<12x8x32xf32>
    "tpu.trace_start"() <{level = 10 : i32, message = "htd,hdk->htk"}> : () -> ()
    %cst_15 = arith.constant dense<0.000000e+00> : vector<12x8x8xf32>
    %40 = tpu.matmul %39, %34, %cst_15 {dimension_numbers = #tpu.dot_dimension_numbers<[2], [1], [1], [2], [0, 0, 0, 1, 1, 2], [0], [0]>} : vector<12x8x32xf32>, vector<12x32x8xf32>, vector<12x8x8xf32> -> vector<12x8x8xf32>
    "tpu.trace_stop"() : () -> ()
    %41 = vector.extract_strided_slice %40 {offsets = [0, 0, 0], sizes = [4, 8, 8], strides = [1, 1, 1]} : vector<12x8x8xf32> to vector<4x8x8xf32>
    %42 = vector.extract_strided_slice %40 {offsets = [4, 0, 0], sizes = [4, 8, 8], strides = [1, 1, 1]} : vector<12x8x8xf32> to vector<4x8x8xf32>
    %43 = vector.extract_strided_slice %40 {offsets = [8, 0, 0], sizes = [4, 8, 8], strides = [1, 1, 1]} : vector<12x8x8xf32> to vector<4x8x8xf32>
    "tpu.trace_start"() <{level = 10 : i32, message = "htd,hsd->hts"}> : () -> ()
    %cst_16 = arith.constant dense<0.000000e+00> : vector<4x8x8xf32>
    %44 = tpu.matmul %41, %42, %cst_16 {dimension_numbers = #tpu.dot_dimension_numbers<[2], [2], [1], [1], [0, 0, 0, 1, 1, 1], [0], [0]>} : vector<4x8x8xf32>, vector<4x8x8xf32>, vector<4x8x8xf32> -> vector<4x8x8xf32>
    "tpu.trace_stop"() : () -> ()
    %cst_17 = arith.constant 0.353553385 : f32
    %45 = vector.broadcast %cst_17 : f32 to vector<4x8x8xf32>
    %46 = arith.mulf %44, %45 : vector<4x8x8xf32>
    %47 = vector.shape_cast %33 : vector<8x8xf32> to vector<1x8x8xf32>
    %48 = vector.broadcast %47 : vector<1x8x8xf32> to vector<4x8x8xf32>
    %49 = arith.addf %46, %48 : vector<4x8x8xf32>
    %cst_18 = arith.constant dense<0xFF800000> : vector<4x8xf32>
    %50 = vector.multi_reduction <maximumf>, %49, %cst_18 [2] : vector<4x8x8xf32> to vector<4x8xf32>
    %51 = vector.shape_cast %50 : vector<4x8xf32> to vector<4x8x1xf32>
    %52 = vector.broadcast %51 : vector<4x8x1xf32> to vector<4x8x8xf32>
    %53 = arith.subf %49, %52 : vector<4x8x8xf32>
    %54 = math.exp %53 : vector<4x8x8xf32>
    %cst_19 = arith.constant dense<0.000000e+00> : vector<4x8xf32>
    %55 = vector.multi_reduction <add>, %54, %cst_19 [2] : vector<4x8x8xf32> to vector<4x8xf32>
    %56 = vector.shape_cast %55 : vector<4x8xf32> to vector<4x8x1xf32>
    %57 = tpu.reciprocal %56 {approx = true} : vector<4x8x1xf32> -> vector<4x8x1xf32>
    %58 = vector.broadcast %57 : vector<4x8x1xf32> to vector<4x8x8xf32>
    %59 = arith.mulf %54, %58 : vector<4x8x8xf32>
    "tpu.trace_start"() <{level = 10 : i32, message = "hts,hsd->htd"}> : () -> ()
    %cst_20 = arith.constant dense<0.000000e+00> : vector<4x8x8xf32>
    %60 = tpu.matmul %59, %43, %cst_20 {dimension_numbers = #tpu.dot_dimension_numbers<[2], [1], [1], [2], [0, 0, 0, 1, 1, 2], [0], [0]>} : vector<4x8x8xf32>, vector<4x8x8xf32>, vector<4x8x8xf32> -> vector<4x8x8xf32>
    "tpu.trace_stop"() : () -> ()
    "tpu.trace_start"() <{level = 10 : i32, message = "htd,hde->hte"}> : () -> ()
    %cst_21 = arith.constant dense<0.000000e+00> : vector<4x8x32xf32>
    %61 = tpu.matmul %60, %35, %cst_21 {dimension_numbers = #tpu.dot_dimension_numbers<[2], [1], [1], [2], [0, 0, 0, 1, 1, 2], [0], [0]>} : vector<4x8x8xf32>, vector<4x8x32xf32>, vector<4x8x32xf32> -> vector<4x8x32xf32>
    "tpu.trace_stop"() : () -> ()
    %cst_22 = arith.constant dense<0.000000e+00> : vector<8x32xf32>
    %62 = vector.multi_reduction <add>, %61, %cst_22 [0] : vector<4x8x32xf32> to vector<8x32xf32>
    %63 = vector.extract_strided_slice %27 {offsets = [8, 0], sizes = [8, 32], strides = [1, 1]} : vector<16x32xf32> to vector<8x32xf32>
    %64 = vector.shape_cast %63 : vector<8x32xf32> to vector<1x8x32xf32>
    %65 = vector.shape_cast %64 : vector<1x8x32xf32> to vector<1x8x32xf32>
    %66 = vector.broadcast %65 : vector<1x8x32xf32> to vector<12x8x32xf32>
    "tpu.trace_start"() <{level = 10 : i32, message = "htd,hdk->htk"}> : () -> ()
    %cst_23 = arith.constant dense<0.000000e+00> : vector<12x8x8xf32>
    %67 = tpu.matmul %66, %34, %cst_23 {dimension_numbers = #tpu.dot_dimension_numbers<[2], [1], [1], [2], [0, 0, 0, 1, 1, 2], [0], [0]>} : vector<12x8x32xf32>, vector<12x32x8xf32>, vector<12x8x8xf32> -> vector<12x8x8xf32>
    "tpu.trace_stop"() : () -> ()
    %68 = vector.extract_strided_slice %67 {offsets = [0, 0, 0], sizes = [4, 8, 8], strides = [1, 1, 1]} : vector<12x8x8xf32> to vector<4x8x8xf32>
    %69 = vector.extract_strided_slice %67 {offsets = [4, 0, 0], sizes = [4, 8, 8], strides = [1, 1, 1]} : vector<12x8x8xf32> to vector<4x8x8xf32>
    %70 = vector.extract_strided_slice %67 {offsets = [8, 0, 0], sizes = [4, 8, 8], strides = [1, 1, 1]} : vector<12x8x8xf32> to vector<4x8x8xf32>
    "tpu.trace_start"() <{level = 10 : i32, message = "htd,hsd->hts"}> : () -> ()
    %cst_24 = arith.constant dense<0.000000e+00> : vector<4x8x8xf32>
    %71 = tpu.matmul %68, %69, %cst_24 {dimension_numbers = #tpu.dot_dimension_numbers<[2], [2], [1], [1], [0, 0, 0, 1, 1, 1], [0], [0]>} : vector<4x8x8xf32>, vector<4x8x8xf32>, vector<4x8x8xf32> -> vector<4x8x8xf32>
    "tpu.trace_stop"() : () -> ()
    %cst_25 = arith.constant 0.353553385 : f32
    %72 = vector.broadcast %cst_25 : f32 to vector<4x8x8xf32>
    %73 = arith.mulf %71, %72 : vector<4x8x8xf32>
    %74 = vector.shape_cast %33 : vector<8x8xf32> to vector<1x8x8xf32>
    %75 = vector.broadcast %74 : vector<1x8x8xf32> to vector<4x8x8xf32>
    %76 = arith.addf %73, %75 : vector<4x8x8xf32>
    %cst_26 = arith.constant dense<0xFF800000> : vector<4x8xf32>
    %77 = vector.multi_reduction <maximumf>, %76, %cst_26 [2] : vector<4x8x8xf32> to vector<4x8xf32>
    %78 = vector.shape_cast %77 : vector<4x8xf32> to vector<4x8x1xf32>
    %79 = vector.broadcast %78 : vector<4x8x1xf32> to vector<4x8x8xf32>
    %80 = arith.subf %76, %79 : vector<4x8x8xf32>
    %81 = math.exp %80 : vector<4x8x8xf32>
    %cst_27 = arith.constant dense<0.000000e+00> : vector<4x8xf32>
    %82 = vector.multi_reduction <add>, %81, %cst_27 [2] : vector<4x8x8xf32> to vector<4x8xf32>
    %83 = vector.shape_cast %82 : vector<4x8xf32> to vector<4x8x1xf32>
    %84 = tpu.reciprocal %83 {approx = true} : vector<4x8x1xf32> -> vector<4x8x1xf32>
    %85 = vector.broadcast %84 : vector<4x8x1xf32> to vector<4x8x8xf32>
    %86 = arith.mulf %81, %85 : vector<4x8x8xf32>
    "tpu.trace_start"() <{level = 10 : i32, message = "hts,hsd->htd"}> : () -> ()
    %cst_28 = arith.constant dense<0.000000e+00> : vector<4x8x8xf32>
    %87 = tpu.matmul %86, %70, %cst_28 {dimension_numbers = #tpu.dot_dimension_numbers<[2], [1], [1], [2], [0, 0, 0, 1, 1, 2], [0], [0]>} : vector<4x8x8xf32>, vector<4x8x8xf32>, vector<4x8x8xf32> -> vector<4x8x8xf32>
    "tpu.trace_stop"() : () -> ()
    "tpu.trace_start"() <{level = 10 : i32, message = "htd,hde->hte"}> : () -> ()
    %cst_29 = arith.constant dense<0.000000e+00> : vector<4x8x32xf32>
    %88 = tpu.matmul %87, %35, %cst_29 {dimension_numbers = #tpu.dot_dimension_numbers<[2], [1], [1], [2], [0, 0, 0, 1, 1, 2], [0], [0]>} : vector<4x8x8xf32>, vector<4x8x32xf32>, vector<4x8x32xf32> -> vector<4x8x32xf32>
    "tpu.trace_stop"() : () -> ()
    %cst_30 = arith.constant dense<0.000000e+00> : vector<8x32xf32>
    %89 = vector.multi_reduction <add>, %88, %cst_30 [0] : vector<4x8x32xf32> to vector<8x32xf32>
    %90 = tpu.concatenate %62, %89 in 0 : vector<8x32xf32>, vector<8x32xf32> -> vector<16x32xf32>
    %91 = vector.broadcast %6 : vector<1x32xf32> to vector<16x32xf32>
    %92 = arith.addf %90, %91 : vector<16x32xf32>
    %93 = arith.addf %0, %92 : vector<16x32xf32>
    %cst_31 = arith.constant dense<0.000000e+00> : vector<16xf32>
    %94 = vector.multi_reduction <add>, %93, %cst_31 [1] : vector<16x32xf32> to vector<16xf32>
    %95 = vector.shape_cast %94 : vector<16xf32> to vector<16x1xf32>
    %cst_32 = arith.constant 3.200000e+01 : f32
    %96 = vector.broadcast %cst_32 : f32 to vector<16x1xf32>
    %97 = arith.divf %95, %96 : vector<16x1xf32>
    %98 = vector.broadcast %97 : vector<16x1xf32> to vector<16x32xf32>
    %99 = arith.subf %93, %98 : vector<16x32xf32>
    %100 = arith.mulf %99, %99 : vector<16x32xf32>
    %cst_33 = arith.constant dense<0.000000e+00> : vector<16xf32>
    %101 = vector.multi_reduction <add>, %100, %cst_33 [1] : vector<16x32xf32> to vector<16xf32>
    %102 = vector.shape_cast %101 : vector<16xf32> to vector<16x1xf32>
    %cst_34 = arith.constant 3.200000e+01 : f32
    %103 = vector.broadcast %cst_34 : f32 to vector<16x1xf32>
    %104 = arith.divf %102, %103 : vector<16x1xf32>
    %cst_35 = arith.constant 9.99999974E-6 : f32
    %105 = vector.broadcast %cst_35 : f32 to vector<16x1xf32>
    %106 = arith.addf %104, %105 : vector<16x1xf32>
    %107 = math.rsqrt %106 : vector<16x1xf32>
    %108 = vector.broadcast %107 : vector<16x1xf32> to vector<16x32xf32>
    %109 = arith.mulf %99, %108 : vector<16x32xf32>
    %110 = vector.broadcast %4 : vector<1x32xf32> to vector<16x32xf32>
    %111 = arith.mulf %109, %110 : vector<16x32xf32>
    %112 = vector.broadcast %5 : vector<1x32xf32> to vector<16x32xf32>
    %113 = arith.addf %111, %112 : vector<16x32xf32>
    %c0_36 = arith.constant 0 : index
    %c0_37 = arith.constant 0 : index
    %114 = vector.load %arg4[%c0_36, %c0_37] : memref<32x128xf32, #tpu.memory_space<vmem>>, vector<32x128xf32>
    %cst_38 = arith.constant dense<0.000000e+00> : vector<16x128xf32>
    %115 = tpu.matmul %113, %114, %cst_38 {dimension_numbers = #tpu.dot_dimension_numbers<[1], [0], [0], [1], [0, 0, 1, 1], [], []>} : vector<16x32xf32>, vector<32x128xf32>, vector<16x128xf32> -> vector<16x128xf32>
    %c0_39 = arith.constant 0 : index
    %c0_40 = arith.constant 0 : index
    %116 = vector.load %arg5[%c0_39, %c0_40] : memref<1x128xf32, #tpu.memory_space<vmem>>, vector<1x128xf32>
    %117 = vector.broadcast %116 : vector<1x128xf32> to vector<16x128xf32>
    %118 = arith.addf %115, %117 : vector<16x128xf32>
    %cst_41 = arith.constant 5.000000e-01 : f32
    %119 = vector.broadcast %cst_41 : f32 to vector<16x128xf32>
    %120 = arith.mulf %119, %118 : vector<16x128xf32>
    %cst_42 = arith.constant 4.471500e-02 : f32
    %121 = vector.broadcast %cst_42 : f32 to vector<16x128xf32>
    %122 = arith.mulf %121, %118 : vector<16x128xf32>
    %123 = arith.mulf %122, %118 : vector<16x128xf32>
    %124 = arith.mulf %123, %118 : vector<16x128xf32>
    %125 = arith.addf %118, %124 : vector<16x128xf32>
    %cst_43 = arith.constant 0.797884583 : f32
    %126 = vector.broadcast %cst_43 : f32 to vector<16x128xf32>
    %127 = arith.mulf %126, %125 : vector<16x128xf32>
    %128 = math.tanh %127 : vector<16x128xf32>
    %cst_44 = arith.constant 1.000000e+00 : f32
    %129 = vector.broadcast %cst_44 : f32 to vector<16x128xf32>
    %130 = arith.addf %129, %128 : vector<16x128xf32>
    %131 = arith.mulf %120, %130 : vector<16x128xf32>
    %c0_45 = arith.constant 0 : index
    %c0_46 = arith.constant 0 : index
    %132 = vector.load %arg6[%c0_45, %c0_46] : memref<128x32xf32, #tpu.memory_space<vmem>>, vector<128x32xf32>
    %cst_47 = arith.constant dense<0.000000e+00> : vector<16x32xf32>
    %133 = tpu.matmul %131, %132, %cst_47 {dimension_numbers = #tpu.dot_dimension_numbers<[1], [0], [0], [1], [0, 0, 1, 1], [], []>} : vector<16x128xf32>, vector<128x32xf32>, vector<16x32xf32> -> vector<16x32xf32>
    %134 = vector.broadcast %7 : vector<1x32xf32> to vector<16x32xf32>
    %135 = arith.addf %133, %134 : vector<16x32xf32>
    %136 = arith.addf %93, %135 : vector<16x32xf32>
    %c0_48 = arith.constant 0 : index
    %c0_49 = arith.constant 0 : index
    %137 = vector.load %arg8[%c0_48, %c0_49] : memref<16x32xf32, #tpu.memory_space<vmem>>, vector<16x32xf32>
    tpu.vector_store %arg8[%c0_48, %c0_49], %136 {strides = array<i32>} : memref<16x32xf32, #tpu.memory_space<vmem>>, vector<16x32xf32>,
    return
  }
  func.func @transform_0(%arg0: i32) -> (i32, i32) {
    %c0_i32 = arith.constant 0 : i32
    %c0_i32_0 = arith.constant 0 : i32
    return %arg0, %c0_i32 : i32, i32
  }
  func.func @transform_1(%arg0: i32) -> (i32, i32, i32) {
    %c0_i32 = arith.constant 0 : i32
    %c0_i32_0 = arith.constant 0 : i32
    %c0_i32_1 = arith.constant 0 : i32
    %c0_i32_2 = arith.constant 0 : i32
    return %c0_i32, %c0_i32_0, %c0_i32_1 : i32, i32, i32
  }
  func.func @transform_2(%arg0: i32) -> (i32, i32, i32) {
    %c0_i32 = arith.constant 0 : i32
    %c0_i32_0 = arith.constant 0 : i32
    %c0_i32_1 = arith.constant 0 : i32
    %c0_i32_2 = arith.constant 0 : i32
    return %c0_i32, %c0_i32_0, %c0_i32_1 : i32, i32, i32
  }
  func.func @transform_3(%arg0: i32) -> (i32, i32) {
    %c0_i32 = arith.constant 0 : i32
    %c0_i32_0 = arith.constant 0 : i32
    %c0_i32_1 = arith.constant 0 : i32
    return %c0_i32, %c0_i32_0 : i32, i32
  }
  func.func @transform_4(%arg0: i32) -> (i32, i32) {
    %c0_i32 = arith.constant 0 : i32
    %c0_i32_0 = arith.constant 0 : i32
    %c0_i32_1 = arith.constant 0 : i32
    return %c0_i32, %c0_i32_0 : i32, i32
  }
  func.func @transform_5(%arg0: i32) -> (i32, i32) {
    %c0_i32 = arith.constant 0 : i32
    %c0_i32_0 = arith.constant 0 : i32
    %c0_i32_1 = arith.constant 0 : i32
    return %c0_i32, %c0_i32_0 : i32, i32
  }
  func.func @transform_6(%arg0: i32) -> (i32, i32) {
    %c0_i32 = arith.constant 0 : i32
    %c0_i32_0 = arith.constant 0 : i32
    %c0_i32_1 = arith.constant 0 : i32
    return %c0_i32, %c0_i32_0 : i32, i32
  }
  func.func @transform_7(%arg0: i32) -> (i32, i32) {
    %c0_i32 = arith.constant 0 : i32
    %c0_i32_0 = arith.constant 0 : i32
    return %arg0, %c0_i32 : i32, i32
  }
}

</mosaic_0001>

<bundles_post_ra>
// kernel: transformer_block.1
= control target key start
LH: loop header
LB: loop body
LE: loop exit
PB: predicated region body
PF: predicated region fallthrough
CT: control target
= control target key end

     0   :  { %vm30_vm0 = vcmask 261120   ;;  %s2292_s0 = inlined_call_operand.vmem [shape: f32[16,32], index: 0, kind: input, shape index: {}]   ;;  %s2293_s1 = inlined_call_operand.vmem [shape: f32[12,32,8], index: 1, kind: input, shape index: {}]   ;;  %s2294_s2 = inlined_call_operand.vmem [shape: f32[4,8,32], index: 2, kind: input, shape index: {}]   ;;  %s2295_s3 = inlined_call_operand.vmem [shape: f32[32,128], index: 3, kind: input, shape index: {}]   ;;  %s2296_s4 = inlined_call_operand.vmem [shape: f32[1,128], index: 4, kind: input, shape index: {}]   ;;  %s2297_s5 = inlined_call_operand.vmem [shape: f32[128,32], index: 5, kind: input, shape index: {}]   ;;  %s2298_s6 = inlined_call_operand.vmem [shape: f32[6,32], index: 6, kind: input, shape index: {}]   ;;  %s2299_s7 = inlined_call_operand.hbm [shape: f32[16,32], index: 7, kind: output, shape index: {}]  }
   0x1   :  { %v1683_v0 = vld [vmem:[%s2292_s0] sm:$0xff] }
   0x2   :  { %2310 = vst [vmem:[#allocation5_spill] sm:$0xff] %v1683_v0  ;;  %v31_v1 = vsel %vm30_vm0, %v1683_v0, 0.0 }
   0x3   :  { %12 = vsyncpa [#allocation3], 0  ;;  %32 = vadd.xlane.f32.xlu0 %v31_v1  ;;  %v1635_v2 = vmov 32.0   ;;  %v1699_v14 = vld [vmem:[%s2293_s1 + $0x18] sm:$0xff]  ;;  %v1717_v17 = vld [vmem:[%s2293_s1 + $0x10] sm:$0xff]  ;;  %vm389_vm5 = vcmask 64512  }
   0x4   :  { %1563 = vrcp.f32 %v1635_v2  ;;  %v1704_v15 = vld [vmem:[%s2293_s1 + $0x38] sm:$0xff]  ;;  %161 = vmatpush.msra.mxu0 %v1699_v14  ;;  %v1722_v18 = vld [vmem:[%s2293_s1 + $0x30] sm:$0xff]  ;;  %v1735_v20 = vld [vmem:[%s2293_s1 + $0x8] sm:$0xff]  ;;  %s1487_s28 = sshll.u32 %s2299_s7, 4  ;;  %s1638_s29 = smov 128   ;;  %s1488_s28 = int_to_ptr.hbm [resolvable:$true] %s1487_s28 }
   0x5   :  { %v1709_v16 = vld [vmem:[%s2293_s1 + $0x78] sm:$0xff]  ;;  %181 = vmatpush.msra.mxu2 %v1704_v15  ;;  %v1727_v19 = vld [vmem:[%s2293_s1 + $0x70] sm:$0xff]  ;;  %v1740_v21 = vld [vmem:[%s2293_s1 + $0x28] sm:$0xff] }
   0x6   :  { %221 = vmatpush.msra.mxu3 %v1709_v16  ;;  %162 = vmatpush.msra.mxu0 %v1717_v17  ;;  %v1745_v22 = vld [vmem:[%s2293_s1 + $0x68] sm:$0xff]  ;;  %v1753_v23 = vld [vmem:[%s2293_s1] sm:$0xff]  ;;  %v1771_v26 = vld [vmem:[%s2293_s1 + $0x58] sm:$0xff] }
   0x7   :  { %182 = vmatpush.msra.mxu2 %v1722_v18  ;;  %v1758_v24 = vld [vmem:[%s2293_s1 + $0x20] sm:$0xff]  ;;  %v1776_v27 = vld [vmem:[%s2293_s1 + $0x98] sm:$0xff]  ;;  %v1788_v29 = vld [vmem:[%s2293_s1 + $0x50] sm:$0xff] }
   0x8   :  { %222 = vmatpush.msra.mxu3 %v1727_v19  ;;  %163 = vmatpush.msra.mxu0 %v1735_v20  ;;  %v1763_v25 = vld [vmem:[%s2293_s1 + $0x60] sm:$0xff]  ;;  %v1781_v28 = vld [vmem:[%s2293_s1 + $0xb8] sm:$0xff]  ;;  %v1793_v30 = vld [vmem:[%s2293_s1 + $0x90] sm:$0xff] }
   0x9   :  { %183 = vmatpush.msra.mxu2 %v1740_v21  ;;  %v1798_v31 = vld [vmem:[%s2293_s1 + $0xb0] sm:$0xff]  ;;  %v1804_v33 = vld [vmem:[%s2293_s1 + $0x48] sm:$0xff]  ;;  %v1823_v37 = vld [vmem:[%s2293_s1 + $0x40] sm:$0xff] }
   0xa   :  { %v1564_v3 = vpop.eup %1563  ;;  %223 = vmatpush.msra.mxu3 %v1745_v22  ;;  %164 = vmatpush.msra.mxu0 %v1753_v23  ;;  %v1809_v34 = vld [vmem:[%s2293_s1 + $0x88] sm:$0xff]  ;;  %v1828_v38 = vld [vmem:[%s2293_s1 + $0x80] sm:$0xff]  ;;  %v1856_v54 = vld [vmem:[%s2293_s1 + $0xd8] sm:$0xff] }
   0xb   :  { %v38_v4 = vmul.f32 32.0, %v1564_v3  ;;  %vm42_vm1 = vweird.f32 %v1564_v3  ;;  %184 = vmatpush.msra.mxu2 %v1758_v24  ;;  %v1817_v36 = vld [vmem:[%s2293_s1 + $0xa8] sm:$0xff]  ;;  %v1835_v40 = vld [vmem:[%s2293_s1 + $0xa0] sm:$0xff]  ;;  %v1861_v55 = vld [vmem:[%s2293_s1 + $0xf8] sm:$0xff] }
   0xc   :  { %224 = vmatpush.msra.mxu3 %v1763_v25  ;;  %241 = vmatpush.msrb.mxu0 %v1776_v27  ;;  %v1844_v45 = vld [vmem:[%s2298_s6] sm:$0x3f]  ;;  %v1866_v56 = vld [vmem:[%s2293_s1 + $0x118] sm:$0xff]  ;;  %v1873_v57 = vld [vmem:[%s2293_s1 + $0xd0] sm:$0xff] }
   0xd   :  { %v39_v5 = vsub.f32 1.0, %v38_v4  ;;  %201 = vmatpush.msrb.mxu2 %v1771_v26  ;;  %v2301_v48 = vperm.slane %v1844_v45, 0  ;;  %v2300_v50 = vperm.slane %v1844_v45, 1  ;;  %v1880_v58 = vld [vmem:[%s2293_s1 + $0xf0] sm:$0xff]  ;;  %v1892_v60 = vld [vmem:[%s2293_s1 + $0xc8] sm:$0xff]  ;;  %v1910_v63 = vld [vmem:[%s2293_s1 + $0xc0] sm:$0xff] }
   0xe   :  { %261 = vmatpush.msrb.mxu3 %v1781_v28  ;;  %242 = vmatpush.msrb.mxu0 %v1793_v30  ;;  %v1885_v59 = vld [vmem:[%s2293_s1 + $0x110] sm:$0xff]  ;;  %v1898_v61 = vld [vmem:[%s2293_s1 + $0xe8] sm:$0xff]  ;;  %v1918_v1 = vld [vmem:[%s2293_s1 + $0x100] sm:$0xff] }
   0xf   :  { %v40_v6 = vmul.f32 %v1564_v3, %v39_v5  ;;  %202 = vmatpush.msrb.mxu2 %v1788_v29  ;;  %v1903_v62 = vld [vmem:[%s2293_s1 + $0x108] sm:$0xff]  ;;  %2311 = vst [vmem:[#allocation6_spill] sm:$0xff] %v1918_v1  ;;  %v1924_v2 = vld [vmem:[%s2293_s1 + $0xe0] sm:$0xff]  ;;  %v1936_v4 = vld [vmem:[%s2293_s1 + $0x178] sm:$0xff] }
  0x10   :  { %262 = vmatpush.msrb.mxu3 %v1798_v31  ;;  %243 = vmatpush.msrb.mxu0 %v1809_v34  ;;  %v1943_v5 = vld [vmem:[%s2293_s1 + $0x130] sm:$0xff] }
  0x11   :  { %v41_v7 = vadd.f32 %v1564_v3, %v40_v6  ;;  %203 = vmatpush.msrb.mxu2 %v1804_v33  ;;  %v1950_v6 = vld [vmem:[%s2293_s1 + $0x170] sm:$0xff] }
  0x12   :  { %263 = vmatpush.msrb.mxu3 %v1817_v36  ;;  %244 = vmatpush.msrb.mxu0 %v1828_v38 }
  0x13   :  { %v1687_v8 = vsel %vm42_vm1, %v1564_v3, %v41_v7  ;;  %204 = vmatpush.msrb.mxu2 %v1823_v37  ;;  %v1929_v3 = vld [vmem:[%s2293_s1 + $0x138] sm:$0xff]  ;;  %v1956_v7 = vld [vmem:[%s2293_s1 + $0x128] sm:$0xff] }
  0x14   :  { %264 = vmatpush.msrb.mxu3 %v1835_v40 }
  0x76   :  { %v33_v9 = vpop.xlane.xlu0 %32 }
  0x77   :  { %v44_v10 = vmul.f32 %v1687_v8, %v33_v9  ;;  %v1962_v9 = vld [vmem:[%s2293_s1 + $0x168] sm:$0xff] }
  0x78   :  { %2312 = vst [vmem:[#allocation7_spill] sm:$0xff] %v1962_v9 }
  0x79   :  { %v1691_v11 = vsub.f32 %v1683_v0, %v44_v10  ;;  %v1969_v10 = vld [vmem:[%s2293_s1 + $0x120] sm:$0xff] }
  0x7a   :  { %2313 = vst [vmem:[#allocation8_spill] sm:$0xff] %v1969_v10 }
  0x7b   :  { %v48_v12 = vmul.f32 %v1691_v11, %v1691_v11 }
  0x7d   :  { %v50_v13 = vsel %vm30_vm0, %v48_v12, 0.0  ;;  %v1980_v12 = vld [vmem:[%s2293_s1 + $0x158] sm:$0xff] }
  0x7e   :  { %51 = vadd.xlane.f32.xlu0 %v50_v13  ;;  %v1989_v13 = vld [vmem:[%s2293_s1 + $0x150] sm:$0xff] }
  0xf1   :  { %v52_v32 = vpop.xlane.xlu0 %51 }
  0xf2   :  { %v56_v35 = vmul.f32 %v52_v32, %v1687_v8  ;;  %v1996_v32 = vld [vmem:[%s2293_s1 + $0x148] sm:$0xff] }
  0xf4   :  { %v58_v39 = vadd.f32 1e-05, %v56_v35  ;;  %v2003_v35 = vld [vmem:[%s2293_s1 + $0x140] sm:$0xff] }
  0xf5   :  { %2315 = vst [vmem:[#allocation10_spill] sm:$0xff] %v2003_v35 }
  0xf6   :  { %1565 = vrsqrt.f32 %v58_v39  ;;  %vm66_vm3 = vweird.f32 %v58_v39 }
  0xfc   :  { %v1566_v41 = vpop.eup %1565 }
  0xfd   :  { %v61_v42 = vmul.f32 %v1566_v41, %v58_v39  ;;  %vm67_vm2 = vweird.f32 %v1566_v41 }
  0xfe   :  { %vm68_vm4 = vmor %vm66_vm3, %vm67_vm2 }
  0xff   :  { %v62_v43 = vmul.f32 %v1566_v41, %v61_v42 }
 0x101   :  { %v63_v44 = vmul.f32 0.5, %v62_v43 }
 0x103   :  { %v64_v46 = vsub.f32 1.5, %v63_v44 }
 0x105   :  { %v65_v47 = vmul.f32 %v1566_v41, %v64_v46 }
 0x107   :  { %v69_v49 = vsel %vm68_vm4, %v1566_v41, %v65_v47 }
 0x108   :  { %v80_v51 = vmul.f32 %v69_v49, %v1691_v11  ;;  %v1975_v11 = vld [vmem:[%s2293_s1 + $0x160] sm:$0xff]  ;;  %s1639_s1 = smov 8  }
 0x109   :  { %2314 = vst [vmem:[#allocation9_spill] sm:$0xff] %v1975_v11 }
 0x10a   :  { %v83_v52 = vmul.f32 %v2301_v48, %v80_v51 }
 0x10c   :  { %v86_v53 = vadd.f32 %v2300_v50, %v83_v52  ;;  %v1636_v50 = vmov -1e+09  }
 0x10e   :  { %1499 = vmatmul.msk.f32.vlgmr.msra.gmra.mxu0 %vm30_vm0, %v86_v53  ;;  %1500 = vmatmul.msk.f32.vlgmr.msra.gmra.mxu2 %vm30_vm0, %v86_v53 }
 0x10f   :  { %1502 = vmatmul.msk.f32.vlgmr.msra.gmra.mxu3 %vm30_vm0, %v86_v53  ;;  %281 = vmatpush.msra.mxu2 %v1856_v54 }
 0x110   :  { %301 = vmatpush.msra.mxu3 %v1861_v55  ;;  %321 = vmatpush.msra.mxu0 %v1866_v56 }
 0x111   :  { %282 = vmatpush.msra.mxu2 %v1873_v57 }
 0x112   :  { %302 = vmatpush.msra.mxu3 %v1880_v58  ;;  %322 = vmatpush.msra.mxu0 %v1885_v59 }
 0x113   :  { %283 = vmatpush.msra.mxu2 %v1892_v60 }
 0x114   :  { %303 = vmatpush.msra.mxu3 %v1898_v61  ;;  %323 = vmatpush.msra.mxu0 %v1903_v62 }
 0x115   :  { %284 = vmatpush.msra.mxu2 %v1910_v63 }
 0x116   :  { %1501 = vmatmul.msk.f32.vlgmr.msrb.gmra.mxu2 %vm30_vm0, %v86_v53  ;;  %1503 = vmatmul.msk.f32.vlgmr.msrb.gmra.mxu0 %vm30_vm0, %v86_v53 }
 0x117   :  { %1504 = vmatmul.msk.f32.vlgmr.msrb.gmra.mxu3 %vm30_vm0, %v86_v53  ;;  %324 = vmatpush.msra.mxu0 %v1918_v1 }
 0x118   :  { %304 = vmatpush.msra.mxu3 %v1924_v2  ;;  %341 = vmatpush.msrb.mxu2 %v1929_v3 }
 0x11a   :  { %381 = vmatpush.msrb.mxu3 %v1936_v4  ;;  %342 = vmatpush.msrb.mxu2 %v1943_v5 }
 0x11c   :  { %382 = vmatpush.msrb.mxu3 %v1950_v6  ;;  %343 = vmatpush.msrb.mxu2 %v1956_v7 }
 0x11e   :  { %383 = vmatpush.msrb.mxu3 %v1962_v9  ;;  %1505 = vmatmul.msk.f32.vlgmr.msra.gmra.mxu2 %vm30_vm0, %v86_v53 }
 0x11f   :  { %1507 = vmatmul.msk.f32.vlgmr.msra.gmra.mxu0 %vm30_vm0, %v86_v53  ;;  %1506 = vmatmul.msk.f32.vlgmr.msra.gmra.mxu3 %vm30_vm0, %v86_v53 }
 0x120   :  { %344 = vmatpush.msrb.mxu2 %v1969_v10  ;;  %384 = vmatpush.msrb.mxu3 %v1975_v11 }
 0x122   :  { %361 = vmatpush.msra.mxu2 %v1980_v12 }
 0x124   :  { %362 = vmatpush.msra.mxu2 %v1989_v13 }
 0x126   :  { %363 = vmatpush.msra.mxu2 %v1996_v32 }
 0x127   :  { %1508 = vmatmul.msk.f32.vlgmr.msrb.gmra.mxu2 %vm30_vm0, %v86_v53  ;;  %1510 = vmatmul.msk.f32.vlgmr.msrb.gmra.mxu3 %vm30_vm0, %v86_v53 }
 0x128   :  { %364 = vmatpush.msra.mxu2 %v2003_v35 }
 0x12f   :  { %1509 = vmatmul.msk.f32.vlgmr.msra.gmra.mxu2 %vm30_vm0, %v86_v53 }
 0x18b   :  { %v166_v39 = vpop.f32.mrf.mxu0 }
 0x191   :  { %v186_v41 = vpop.f32.mrf.mxu2 }
 0x192   :  { %v226_v42 = vpop.f32.mrf.mxu3 }
 0x193   :  { %v246_v43 = vpop.f32.mrf.mxu0 }
 0x194   :  { %1511 = vmatpush.xpose.msk.msrb.mxu0 %vm389_vm5, %v246_v43  ;;  %v88_v43 = vlaneseq }
 0x197   :  { %1512 = vmatmul.msk.f32.vlgmr.msrb.gmra.mxu0 %vm389_vm5, %v166_v39 }
 0x199   :  { %v206_v44 = vpop.f32.mrf.mxu2 }
 0x19a   :  { %v266_v46 = vpop.f32.mrf.mxu3 }
 0x19b   :  { %1513 = vmatpush.xpose.msk.msra.mxu1 %vm389_vm5, %v266_v46  ;;  %v89_v46 = vshrl.u32 %v88_v43, 7 }
 0x19c   :  { %v326_v47 = vpop.f32.mrf.mxu0 }
 0x19d   :  { %564 = vmatpush.msra.mxu0 %v326_v47  ;;  %v91_v47 = vand.u32 127, %v88_v43 }
 0x19e   :  { %1514 = vmatmul.msk.f32.vlgmr.msra.gmra.mxu1 %vm389_vm5, %v186_v41 }
 0x19f   :  { %vm92_vm6 = vcmp.le.s32.totalorder %v91_v47, %v89_v46 }
 0x1a0   :  { %v2017_v48 = vsel %vm92_vm6, 0.0, %v1636_v50 }
 0x1a1   :  { %v286_v49 = vpop.f32.mrf.mxu2  ;;  %2316 = vst [vmem:[#allocation11_spill] sm:$0xff] %v2017_v48 }
 0x1a2   :  { %v306_v51 = vpop.f32.mrf.mxu3  ;;  %1515 = vmatpush.xpose.msk.msrb.mxu2 %vm389_vm5, %v286_v49 }
 0x1a3   :  { %1517 = vmatpush.xpose.msk.msra.mxu3 %vm389_vm5, %v306_v51 }
 0x1a5   :  { %1516 = vmatmul.msk.f32.vlgmr.msrb.gmra.mxu2 %vm389_vm5, %v206_v44 }
 0x1a6   :  { %1518 = vmatmul.msk.f32.vlgmr.msra.gmra.mxu3 %vm389_vm5, %v226_v42 }
 0x1aa   :  { %v346_v52 = vpop.f32.mrf.mxu2  ;;  %v386_v53 = vpop.f32.mrf.mxu3 }
 0x1ab   :  { %587 = vmatpush.msrb.mxu1 %v346_v52  ;;  %633 = vmatpush.msrb.mxu3 %v386_v53 }
 0x1b2   :  { %v366_v39 = vpop.f32.mrf.mxu2 }
 0x1b3   :  { %610 = vmatpush.msra.mxu2 %v366_v39 }
 0x214   :  { %v413_v41 = vpop.f32.mrf.mxu0 }
 0x215   :  { %v494_v49 = vmul.f32 0.35355338, %v413_v41 }
 0x217   :  { %v498_v51 = vadd.f32 %v494_v49, %v2017_v48 }
 0x219   :  { %v502_v44 = vsel %vm389_vm5, %v498_v51, -inf }
 0x21a   :  { %503 = vmax.xlane.f32.xlu2 %v502_v44 }
 0x21b   :  { %v439_v42 = vpop.f32.mrf.mxu1 }
 0x21c   :  { %v495_v0 = vmul.f32 0.35355338, %v439_v42 }
 0x21e   :  { %v499_v52 = vadd.f32 %v495_v0, %v2017_v48 }
 0x220   :  { %v505_v53 = vsel %vm389_vm5, %v499_v52, -inf }
 0x222   :  { %506 = vmax.xlane.f32.xlu2 %v505_v53 }
 0x228   :  { %v465_v39 = vpop.f32.mrf.mxu2 }
 0x229   :  { %v496_v43 = vmul.f32 0.35355338, %v465_v39  ;;  %v491_v46 = vpop.f32.mrf.mxu3 }
 0x22a   :  { %v497_v50 = vmul.f32 0.35355338, %v491_v46 }
 0x22b   :  { %v500_v47 = vadd.f32 %v496_v43, %v2017_v48 }
 0x22c   :  { %v501_v49 = vadd.f32 %v497_v50, %v2017_v48 }
 0x22d   :  { %v508_v41 = vsel %vm389_vm5, %v500_v47, -inf }
 0x22e   :  { %509 = vmax.xlane.f32.xlu1 %v508_v41  ;;  %v511_v44 = vsel %vm389_vm5, %v501_v49, -inf }
 0x236   :  { %512 = vmax.xlane.f32.xlu1 %v511_v44 }
 0x28d   :  { %v504_v42 = vpop.xlane.xlu2 %503 }
 0x28e   :  { %v514_v11 = vsub.f32 %v498_v51, %v504_v42 }
 0x290   :  { %v518_v0 = vmul.f32 1.442695, %v514_v11 }
 0x292   :  { %1567 = vpow2.f32 %v518_v0 }
 0x295   :  { %v507_v39 = vpop.xlane.xlu2 %506 }
 0x296   :  { %v515_v46 = vsub.f32 %v499_v52, %v507_v39 }
 0x298   :  { %v1568_v35 = vpop.eup %1567  ;;  %v520_v41 = vmul.f32 1.442695, %v515_v46 }
 0x299   :  { %v526_v53 = vsel %vm389_vm5, %v1568_v35, 0.0 }
 0x29a   :  { %527 = vadd.xlane.f32.xlu2 %v526_v53 }
 0x2a1   :  { %v510_v10 = vpop.xlane.xlu1 %509 }
 0x2a2   :  { %v516_v43 = vsub.f32 %v500_v47, %v510_v10 }
 0x2a4   :  { %v522_v1 = vmul.f32 1.442695, %v516_v43 }
 0x2a6   :  { %1569 = vpow2.f32 %v522_v1  ;;  %v2034_v1 = vld [vmem:[%s2292_s0 + $0x8] sm:$0xff] }
 0x2a7   :  { %1571 = vpow2.f32 %v520_v41 }
 0x2a9   :  { %v513_v9 = vpop.xlane.xlu1 %512 }
 0x2aa   :  { %v517_v50 = vsub.f32 %v501_v49, %v513_v9  ;;  %v34_v9 = vsel %vm30_vm0, %v2034_v1, 0.0 }
 0x2ac   :  { %v1570_v48 = vpop.eup %1569  ;;  %v524_v44 = vmul.f32 1.442695, %v517_v50 }
 0x2ad   :  { %v532_v51 = vsel %vm389_vm5, %v1570_v48, 0.0  ;;  %v1572_v11 = vpop.eup %1571 }
 0x2ae   :  { %1573 = vpow2.f32 %v524_v44  ;;  %533 = vadd.xlane.f32.xlu0 %v532_v51  ;;  %v529_v53 = vsel %vm389_vm5, %v1572_v11, 0.0 }
 0x2b4   :  { %v1574_v42 = vpop.eup %1573 }
 0x2b5   :  { %v535_v0 = vsel %vm389_vm5, %v1574_v42, 0.0 }
 0x2b6   :  { %536 = vadd.xlane.f32.xlu1 %v535_v0  ;;  %530 = vadd.xlane.f32.xlu0 %v529_v53 }
 0x2be   :  { %35 = vadd.xlane.f32.xlu1 %v34_v9 }
 0x30d   :  { %v528_v10 = vpop.xlane.xlu2 %527 }
 0x30e   :  { %1575 = vrcp.f32 %v528_v10 }
 0x314   :  { %v1576_v52 = vpop.eup %1575 }
 0x315   :  { %v542_v47 = vmul.f32 %v1576_v52, %v1568_v35  ;;  %v2068_v52 = vld [vmem:[%s2294_s2 + $0x8] sm:$0xff] }
 0x316   :  { %679 = vmatpush.msra.mxu1 %v2068_v52 }
 0x317   :  { %1519 = vmatmul.msk.f32.vlgmr.msra.gmra.mxu0 %vm389_vm5, %v542_v47 }
 0x321   :  { %v534_v49 = vpop.xlane.xlu0 %533 }
 0x322   :  { %1577 = vrcp.f32 %v534_v49 }
 0x328   :  { %v1578_v39 = vpop.eup %1577 }
 0x329   :  { %v544_v43 = vmul.f32 %v1578_v39, %v1570_v48  ;;  %v537_v46 = vpop.xlane.xlu1 %536  ;;  %v531_v41 = vpop.xlane.xlu0 %530 }
 0x32a   :  { %1579 = vrcp.f32 %v537_v46 }
 0x32b   :  { %1581 = vrcp.f32 %v531_v41  ;;  %1521 = vmatmul.msk.f32.vlgmr.msra.gmra.mxu2 %vm389_vm5, %v544_v43 }
 0x330   :  { %v1580_v50 = vpop.eup %1579 }
 0x331   :  { %v1582_v44 = vpop.eup %1581  ;;  %v545_v51 = vmul.f32 %v1580_v50, %v1574_v42  ;;  %v36_v0 = vpop.xlane.xlu1 %35  ;;  %v2052_v42 = vld [vmem:[%s2294_s2] sm:$0xff] }
 0x332   :  { %v45_v53 = vmul.f32 %v1687_v8, %v36_v0  ;;  %v543_v9 = vmul.f32 %v1582_v44, %v1572_v11  ;;  %656 = vmatpush.msrb.mxu0 %v2052_v42  ;;  %v2062_v11 = vld [vmem:[%s2294_s2 + $0x10] sm:$0xff]  ;;  %v2324_v44 = vld [vmem:[#allocation11_spill] sm:$0xff] }
 0x333   :  { %1522 = vmatmul.msk.f32.vlgmr.msrb.gmra.mxu3 %vm389_vm5, %v545_v51  ;;  %702 = vmatpush.msrb.mxu2 %v2062_v11 }
 0x334   :  { %v2043_v35 = vsub.f32 %v2034_v1, %v45_v53  ;;  %1520 = vmatmul.msk.f32.vlgmr.msrb.gmra.mxu1 %vm389_vm5, %v543_v9  ;;  %752 = vmatpush.msra.mxu0 %v1699_v14 }
 0x335   :  { %792 = vmatpush.msra.mxu2 %v1771_v26  ;;  %772 = vmatpush.msrb.mxu1 %v1704_v15 }
 0x336   :  { %v49_v48 = vmul.f32 %v2043_v35, %v2043_v35  ;;  %753 = vmatpush.msra.mxu0 %v1717_v17  ;;  %v2080_v17 = vld [vmem:[%s2294_s2 + $0x18] sm:$0xff] }
 0x337   :  { %793 = vmatpush.msra.mxu2 %v1788_v29  ;;  %773 = vmatpush.msrb.mxu1 %v1722_v18 }
 0x338   :  { %v53_v10 = vsel %vm30_vm0, %v49_v48, 0.0  ;;  %754 = vmatpush.msra.mxu0 %v1735_v20  ;;  %725 = vmatpush.msra.mxu3 %v2080_v17 }
 0x339   :  { %54 = vadd.xlane.f32.xlu2 %v53_v10  ;;  %794 = vmatpush.msra.mxu2 %v1804_v33  ;;  %v2318_v33 = vperm.slane %v1844_v45, 1 }
 0x33a   :  { %755 = vmatpush.msra.mxu0 %v1753_v23  ;;  %774 = vmatpush.msrb.mxu1 %v1740_v21 }
 0x33b   :  { %795 = vmatpush.msra.mxu2 %v1823_v37  ;;  %812 = vmatpush.msrb.mxu3 %v1709_v16  ;;  %v2320_v37 = vld [vmem:[#allocation6_spill] sm:$0xff] }
 0x33c   :  { %775 = vmatpush.msrb.mxu1 %v1758_v24 }
 0x33d   :  { %813 = vmatpush.msrb.mxu3 %v1727_v19 }
 0x33f   :  { %814 = vmatpush.msrb.mxu3 %v1745_v22 }
 0x341   :  { %815 = vmatpush.msrb.mxu3 %v1763_v25 }
 0x394   :  { %v566_v14 = vpop.f32.mrf.mxu0 }
 0x395   :  { %1523 = vmatmul.msk.f32.vlgmr.msrb.gmra.mxu0 %vm389_vm5, %v566_v14 }
 0x396   :  { %832 = vmatpush.msrb.mxu0 %v1776_v27 }
 0x398   :  { %833 = vmatpush.msrb.mxu0 %v1793_v30  ;;  %v2317_v30 = vperm.slane %v1844_v45, 0 }
 0x39a   :  { %834 = vmatpush.msrb.mxu0 %v1809_v34 }
 0x39c   :  { %835 = vmatpush.msrb.mxu0 %v1828_v38  ;;  %v2321_v38 = vld [vmem:[#allocation8_spill] sm:$0xff] }
 0x3ac   :  { %v55_v15 = vpop.xlane.xlu2 %54 }
 0x3ad   :  { %v57_v18 = vmul.f32 %v55_v15, %v1687_v8 }
 0x3ae   :  { %v612_v20 = vpop.f32.mrf.mxu2 }
 0x3af   :  { %v59_v21 = vadd.f32 1e-05, %v57_v18  ;;  %1525 = vmatmul.msk.f32.vlgmr.msrb.gmra.mxu2 %vm389_vm5, %v612_v20 }
 0x3b0   :  { %872 = vmatpush.msrb.mxu2 %v1856_v54  ;;  %v2323_v54 = vld [vmem:[#allocation9_spill] sm:$0xff] }
 0x3b1   :  { %1583 = vrsqrt.f32 %v59_v21  ;;  %v589_v16 = vpop.f32.mrf.mxu1  ;;  %vm76_vm8 = vweird.f32 %v59_v21 }
 0x3b2   :  { %1524 = vmatmul.msk.f32.vlgmr.msra.gmra.mxu1 %vm389_vm5, %v589_v16  ;;  %873 = vmatpush.msrb.mxu2 %v1873_v57 }
 0x3b3   :  { %852 = vmatpush.msra.mxu1 %v1781_v28 }
 0x3b4   :  { %874 = vmatpush.msrb.mxu2 %v1892_v60 }
 0x3b5   :  { %853 = vmatpush.msra.mxu1 %v1798_v31 }
 0x3b6   :  { %v635_v19 = vpop.f32.mrf.mxu3  ;;  %875 = vmatpush.msrb.mxu2 %v1910_v63 }
 0x3b7   :  { %v1584_v22 = vpop.eup %1583  ;;  %1526 = vmatmul.msk.f32.vlgmr.msra.gmra.mxu3 %vm389_vm5, %v635_v19  ;;  %854 = vmatpush.msra.mxu1 %v1817_v36  ;;  %v2319_v36 = vld [vmem:[#allocation7_spill] sm:$0xff] }
 0x3b8   :  { %v71_v23 = vmul.f32 %v1584_v22, %v59_v21  ;;  %892 = vmatpush.msra.mxu3 %v1861_v55  ;;  %vm77_vm7 = vweird.f32 %v1584_v22 }
 0x3b9   :  { %855 = vmatpush.msra.mxu1 %v1835_v40  ;;  %vm78_vm9 = vmor %vm76_vm8, %vm77_vm7  ;;  %v2322_v40 = vld [vmem:[#allocation10_spill] sm:$0xff] }
 0x3ba   :  { %v72_v24 = vmul.f32 %v1584_v22, %v71_v23  ;;  %893 = vmatpush.msra.mxu3 %v1880_v58 }
 0x3bc   :  { %v73_v25 = vmul.f32 0.5, %v72_v24  ;;  %894 = vmatpush.msra.mxu3 %v1898_v61 }
 0x3be   :  { %v74_v26 = vsub.f32 1.5, %v73_v25  ;;  %895 = vmatpush.msra.mxu3 %v1924_v2 }
 0x3c0   :  { %v75_v27 = vmul.f32 %v1584_v22, %v74_v26 }
 0x3c2   :  { %v79_v28 = vsel %vm78_vm9, %v1584_v22, %v75_v27 }
 0x3c3   :  { %v81_v29 = vmul.f32 %v79_v28, %v2043_v35 }
 0x3c5   :  { %v84_v31 = vmul.f32 %v2317_v30, %v81_v29  ;;  %v1327_v29 = vperm.slane %v1844_v45, 4 }
 0x3c7   :  { %v87_v34 = vadd.f32 %v2318_v33, %v84_v31 }
 0x3c9   :  { %1527 = vmatmul.msk.f32.vlgmr.msra.gmra.mxu0 %vm30_vm0, %v87_v34  ;;  %1528 = vmatmul.msk.f32.vlgmr.msrb.gmra.mxu1 %vm30_vm0, %v87_v34 }
 0x3ca   :  { %1529 = vmatmul.msk.f32.vlgmr.msra.gmra.mxu2 %vm30_vm0, %v87_v34  ;;  %1530 = vmatmul.msk.f32.vlgmr.msrb.gmra.mxu3 %vm30_vm0, %v87_v34 }
 0x3cb   :  { %912 = vmatpush.msra.mxu0 %v1866_v56  ;;  %932 = vmatpush.msrb.mxu1 %v1929_v3 }
 0x3cc   :  { %952 = vmatpush.msra.mxu2 %v1980_v12  ;;  %972 = vmatpush.msrb.mxu3 %v1936_v4 }
 0x3cd   :  { %913 = vmatpush.msra.mxu0 %v1885_v59  ;;  %933 = vmatpush.msrb.mxu1 %v1943_v5 }
 0x3ce   :  { %953 = vmatpush.msra.mxu2 %v1989_v13  ;;  %973 = vmatpush.msrb.mxu3 %v1950_v6 }
 0x3cf   :  { %914 = vmatpush.msra.mxu0 %v1903_v62  ;;  %934 = vmatpush.msrb.mxu1 %v1956_v7 }
 0x3d0   :  { %954 = vmatpush.msra.mxu2 %v1996_v32  ;;  %974 = vmatpush.msrb.mxu3 %v2319_v36 }
 0x3d1   :  { %1531 = vmatmul.msk.f32.vlgmr.msrb.gmra.mxu0 %vm30_vm0, %v87_v34  ;;  %1532 = vmatmul.msk.f32.vlgmr.msra.gmra.mxu1 %vm30_vm0, %v87_v34 }
 0x3d2   :  { %1533 = vmatmul.msk.f32.vlgmr.msrb.gmra.mxu2 %vm30_vm0, %v87_v34  ;;  %1534 = vmatmul.msk.f32.vlgmr.msra.gmra.mxu3 %vm30_vm0, %v87_v34 }
 0x3d3   :  { %915 = vmatpush.msra.mxu0 %v2320_v37  ;;  %935 = vmatpush.msrb.mxu1 %v2321_v38 }
 0x3d4   :  { %955 = vmatpush.msra.mxu2 %v2322_v40  ;;  %975 = vmatpush.msrb.mxu3 %v2323_v54  ;;  %v2325_v54 = vld [vmem:[#allocation5_spill] sm:$0xff] }
 0x3d9   :  { %1535 = vmatmul.msk.f32.vlgmr.msra.gmra.mxu0 %vm30_vm0, %v87_v34  ;;  %1536 = vmatmul.msk.f32.vlgmr.msrb.gmra.mxu1 %vm30_vm0, %v87_v34 }
 0x3da   :  { %1537 = vmatmul.msk.f32.vlgmr.msra.gmra.mxu2 %vm30_vm0, %v87_v34  ;;  %1538 = vmatmul.msk.f32.vlgmr.msrb.gmra.mxu3 %vm30_vm0, %v87_v34 }
 0x412   :  { %v658_v55 = vpop.f32.mrf.mxu0 }
 0x413   :  { %v730_v57 = vsel %vm30_vm0, %v658_v55, 0.0 }
 0x42f   :  { %v681_v56 = vpop.f32.mrf.mxu1 }
 0x430   :  { %v731_v58 = vsel %vm30_vm0, %v681_v56, 0.0 }
 0x431   :  { %v732_v59 = vadd.f32 %v731_v58, %v730_v57 }
 0x432   :  { %v704_v60 = vpop.f32.mrf.mxu2 }
 0x433   :  { %v733_v61 = vsel %vm30_vm0, %v704_v60, 0.0 }
 0x434   :  { %v734_v62 = vadd.f32 %v733_v61, %v732_v59 }
 0x43a   :  { %v727_v63 = vpop.f32.mrf.mxu3 }
 0x43b   :  { %v735_v2 = vsel %vm30_vm0, %v727_v63, 0.0 }
 0x43c   :  { %v2147_v3 = vadd.f32 %v735_v2, %v734_v62 }
 0x43e   :  { %v1328_v37 = vadd.f32 %v1327_v29, %v2147_v3 }
 0x440   :  { %v2177_v55 = vadd.f32 %v1328_v37, %v2325_v54  ;;  %v1440_v37 = vld [vmem:[%s2297_s5 + $0x18] sm:$0xff]  ;;  %v1439_v54 = vld [vmem:[%s2297_s5 + $0x10] sm:$0xff] }
 0x442   :  { %v1332_v58 = vsel %vm30_vm0, %v2177_v55, 0.0 }
 0x446   :  { %v757_v4 = vpop.f32.mrf.mxu0  ;;  %v777_v5 = vpop.f32.mrf.mxu1 }
 0x44d   :  { %v797_v6 = vpop.f32.mrf.mxu2  ;;  %v817_v7 = vpop.f32.mrf.mxu3 }
 0x44e   :  { %v837_v12 = vpop.f32.mrf.mxu0  ;;  %v857_v13 = vpop.f32.mrf.mxu1 }
 0x44f   :  { %1539 = vmatpush.xpose.msk.msrb.mxu0 %vm389_vm5, %v837_v12  ;;  %1541 = vmatpush.xpose.msk.msra.mxu1 %vm389_vm5, %v857_v13 }
 0x452   :  { %1540 = vmatmul.msk.f32.vlgmr.msrb.gmra.mxu0 %vm389_vm5, %v757_v4  ;;  %1542 = vmatmul.msk.f32.vlgmr.msra.gmra.mxu1 %vm389_vm5, %v777_v5 }
 0x455   :  { %v877_v32 = vpop.f32.mrf.mxu2  ;;  %v897_v47 = vpop.f32.mrf.mxu3 }
 0x456   :  { %1543 = vmatpush.xpose.msk.msrb.mxu2 %vm389_vm5, %v877_v32  ;;  %1545 = vmatpush.xpose.msk.msra.mxu3 %vm389_vm5, %v897_v47  ;;  %v917_v49 = vpop.f32.mrf.mxu0  ;;  %v937_v39 = vpop.f32.mrf.mxu1 }
 0x457   :  { %1154 = vmatpush.msra.mxu0 %v917_v49  ;;  %1177 = vmatpush.msrb.mxu1 %v937_v39 }
 0x459   :  { %1246 = vmatpush.msrb.mxu0 %v2052_v42  ;;  %1269 = vmatpush.msra.mxu1 %v2068_v52 }
 0x45a   :  { %1544 = vmatmul.msk.f32.vlgmr.msrb.gmra.mxu2 %vm389_vm5, %v797_v6  ;;  %1546 = vmatmul.msk.f32.vlgmr.msra.gmra.mxu3 %vm389_vm5, %v817_v7 }
 0x45d   :  { %v957_v43 = vpop.f32.mrf.mxu2  ;;  %v977_v46 = vpop.f32.mrf.mxu3 }
 0x45e   :  { %1200 = vmatpush.msra.mxu2 %v957_v43  ;;  %1223 = vmatpush.msrb.mxu3 %v977_v46  ;;  %v1385_v43 = vld [vmem:[%s2295_s3 + $0x18] sm:$0xff] }
 0x460   :  { %1292 = vmatpush.msrb.mxu2 %v2062_v11  ;;  %1315 = vmatpush.msra.mxu3 %v2080_v17 }
 0x4cf   :  { %v1003_v41 = vpop.f32.mrf.mxu0  ;;  %v1029_v10 = vpop.f32.mrf.mxu1 }
 0x4d0   :  { %v1084_v50 = vmul.f32 0.35355338, %v1003_v41  ;;  %v1085_v14 = vmul.f32 0.35355338, %v1029_v10  ;;  %v1384_v41 = vld [vmem:[%s2295_s3 + $0x10] sm:$0xff] }
 0x4d2   :  { %v1088_v51 = vadd.f32 %v1084_v50, %v2324_v44  ;;  %v1089_v15 = vadd.f32 %v1085_v14, %v2324_v44  ;;  %v1383_v50 = vld [vmem:[%s2295_s3 + $0x8] sm:$0xff] }
 0x4d4   :  { %v1092_v0 = vsel %vm389_vm5, %v1088_v51, -inf  ;;  %v1095_v18 = vsel %vm389_vm5, %v1089_v15, -inf }
 0x4d5   :  { %1093 = vmax.xlane.f32.xlu2 %v1092_v0 }
 0x4dd   :  { %v1055_v53 = vpop.f32.mrf.mxu2  ;;  %v1081_v9 = vpop.f32.mrf.mxu3 }
 0x4de   :  { %v1086_v35 = vmul.f32 0.35355338, %v1055_v53  ;;  %v1087_v48 = vmul.f32 0.35355338, %v1081_v9 }
 0x4e0   :  { %v1091_v42 = vadd.f32 %v1087_v48, %v2324_v44  ;;  %v1090_v52 = vadd.f32 %v1086_v35, %v2324_v44  ;;  %v1382_v44 = vld [vmem:[%s2295_s3] sm:$0xff] }
 0x4e2   :  { %v1101_v11 = vsel %vm389_vm5, %v1091_v42, -inf  ;;  %v1098_v17 = vsel %vm389_vm5, %v1090_v52, -inf }
 0x4e3   :  { %1102 = vmax.xlane.f32.xlu1 %v1101_v11  ;;  %1099 = vmax.xlane.f32.xlu0 %v1098_v17 }
 0x4eb   :  { %1096 = vmax.xlane.f32.xlu0 %v1095_v18 }
 0x548   :  { %v1094_v20 = vpop.xlane.xlu2 %1093 }
 0x549   :  { %v1104_v21 = vsub.f32 %v1088_v51, %v1094_v20 }
 0x54b   :  { %v1108_v16 = vmul.f32 1.442695, %v1104_v21  ;;  %v1379_v21 = vperm.slane %v1844_v45, 3 }
 0x54d   :  { %1585 = vpow2.f32 %v1108_v16 }
 0x553   :  { %v1586_v19 = vpop.eup %1585 }
 0x554   :  { %v1116_v22 = vsel %vm389_vm5, %v1586_v19, 0.0 }
 0x555   :  { %1117 = vadd.xlane.f32.xlu0 %v1116_v22  ;;  %v1452_v22 = vld [vmem:[%s2297_s5 + $0x78] sm:$0xff] }
 0x556   :  { %v1103_v23 = vpop.xlane.xlu1 %1102  ;;  %v1100_v24 = vpop.xlane.xlu0 %1099 }
 0x557   :  { %v1107_v25 = vsub.f32 %v1091_v42, %v1103_v23  ;;  %v1106_v26 = vsub.f32 %v1090_v52, %v1100_v24  ;;  %v1451_v23 = vld [vmem:[%s2297_s5 + $0x70] sm:$0xff]  ;;  %v1450_v24 = vld [vmem:[%s2297_s5 + $0x68] sm:$0xff] }
 0x559   :  { %v1114_v27 = vmul.f32 1.442695, %v1107_v25  ;;  %v1112_v28 = vmul.f32 1.442695, %v1106_v26  ;;  %v1449_v25 = vld [vmem:[%s2297_s5 + $0x60] sm:$0xff]  ;;  %v1448_v26 = vld [vmem:[%s2297_s5 + $0x58] sm:$0xff] }
 0x55b   :  { %1587 = vpow2.f32 %v1114_v27  ;;  %v1447_v27 = vld [vmem:[%s2297_s5 + $0x50] sm:$0xff] }
 0x55c   :  { %1589 = vpow2.f32 %v1112_v28  ;;  %v1446_v28 = vld [vmem:[%s2297_s5 + $0x48] sm:$0xff] }
 0x55e   :  { %v1097_v30 = vpop.xlane.xlu0 %1096 }
 0x55f   :  { %v1105_v31 = vsub.f32 %v1089_v15, %v1097_v30  ;;  %v1376_v15 = vperm.slane %v1844_v45, 2  ;;  %v1445_v30 = vld [vmem:[%s2297_s5 + $0x40] sm:$0xff] }
 0x561   :  { %v1588_v33 = vpop.eup %1587  ;;  %v1110_v34 = vmul.f32 1.442695, %v1105_v31  ;;  %v1444_v31 = vld [vmem:[%s2297_s5 + $0x38] sm:$0xff] }
 0x562   :  { %v1590_v36 = vpop.eup %1589  ;;  %v1125_v38 = vsel %vm389_vm5, %v1588_v33, 0.0 }
 0x563   :  { %1591 = vpow2.f32 %v1110_v34  ;;  %v1122_v40 = vsel %vm389_vm5, %v1590_v36, 0.0  ;;  %1126 = vadd.xlane.f32.xlu2 %v1125_v38  ;;  %v1442_v34 = vld [vmem:[%s2297_s5 + $0x28] sm:$0xff] }
 0x564   :  { %1123 = vadd.xlane.f32.xlu1 %v1122_v40 }
 0x569   :  { %v1592_v56 = vpop.eup %1591 }
 0x56a   :  { %v1119_v57 = vsel %vm389_vm5, %v1592_v56, 0.0 }
 0x56b   :  { %1333 = vadd.xlane.f32.xlu2 %v1332_v58 }
 0x56c   :  { %1120 = vadd.xlane.f32.xlu1 %v1119_v57  ;;  %v1438_v57 = vld [vmem:[%s2297_s5 + $0x8] sm:$0xff] }
 0x5c8   :  { %v1118_v59 = vpop.xlane.xlu0 %1117 }
 0x5c9   :  { %1593 = vrcp.f32 %v1118_v59 }
 0x5cf   :  { %v1594_v60 = vpop.eup %1593 }
 0x5d0   :  { %v1132_v61 = vmul.f32 %v1594_v60, %v1586_v19 }
 0x5d2   :  { %1547 = vmatmul.msk.f32.vlgmr.msra.gmra.mxu0 %vm389_vm5, %v1132_v61 }
 0x5d3   :  { %1408 = vmatpush.msra.mxu0 %v1385_v43 }
 0x5d5   :  { %1409 = vmatpush.msra.mxu0 %v1384_v41 }
 0x5d6   :  { %v1127_v62 = vpop.xlane.xlu2 %1126 }
 0x5d7   :  { %v1124_v63 = vpop.xlane.xlu1 %1123  ;;  %1595 = vrcp.f32 %v1127_v62  ;;  %1410 = vmatpush.msra.mxu0 %v1383_v50  ;;  %v1437_v62 = vld [vmem:[%s2297_s5] sm:$0xff] }
 0x5d8   :  { %1597 = vrcp.f32 %v1124_v63 }
 0x5d9   :  { %1411 = vmatpush.msra.mxu0 %v1382_v44 }
 0x5dd   :  { %v1596_v2 = vpop.eup %1595 }
 0x5de   :  { %v1598_v3 = vpop.eup %1597  ;;  %v1135_v4 = vmul.f32 %v1596_v2, %v1588_v33  ;;  %v1334_v5 = vpop.xlane.xlu2 %1333  ;;  %v1443_v33 = vld [vmem:[%s2297_s5 + $0x30] sm:$0xff] }
 0x5df   :  { %v1134_v6 = vmul.f32 %v1598_v3, %v1590_v36  ;;  %v1121_v7 = vpop.xlane.xlu1 %1120  ;;  %v1338_v12 = vmul.f32 %v1334_v5, %v1687_v8  ;;  %v1441_v36 = vld [vmem:[%s2297_s5 + $0x20] sm:$0xff] }
 0x5e0   :  { %1599 = vrcp.f32 %v1121_v7  ;;  %1550 = vmatmul.msk.f32.vlgmr.msrb.gmra.mxu3 %vm389_vm5, %v1135_v4  ;;  %v1562_v7 = vld [vmem:[%s2296_s4] ss:$0 sm:$0xff]  ;;  %s1637_s4 = smov [#allocation2]  }
 0x5e1   :  { %v1340_v13 = vsub.f32 %v2177_v55, %v1338_v12  ;;  %1549 = vmatmul.msk.f32.vlgmr.msra.gmra.mxu2 %vm389_vm5, %v1134_v6  ;;  %s1485_s5 = sshll.u32 %s1637_s4, 4  ;;  %s1486_s5 = int_to_ptr.vmem [resolvable:$true] %s1485_s5 }
 0x5e3   :  { %v1342_v32 = vmul.f32 %v1340_v13, %v1340_v13 }
 0x5e5   :  { %v1344_v47 = vsel %vm30_vm0, %v1342_v32, 0.0 }
 0x5e6   :  { %v1600_v49 = vpop.eup %1599  ;;  %1345 = vadd.xlane.f32.xlu1 %v1344_v47 }
 0x5e7   :  { %v1133_v39 = vmul.f32 %v1600_v49, %v1592_v56 }
 0x5e9   :  { %1548 = vmatmul.msk.f32.vlgmr.msrb.gmra.mxu1 %vm389_vm5, %v1133_v39 }
 0x5ea   :  { %1454 = vmatpush.msrb.mxu1 %v1452_v22 }
 0x5ec   :  { %1455 = vmatpush.msrb.mxu1 %v1451_v23 }
 0x5ee   :  { %1456 = vmatpush.msrb.mxu1 %v1450_v24 }
 0x5f0   :  { %1457 = vmatpush.msrb.mxu1 %v1449_v25 }
 0x5f2   :  { %1458 = vmatpush.msrb.mxu1 %v1448_v26 }
 0x5f4   :  { %1459 = vmatpush.msrb.mxu1 %v1447_v27 }
 0x5f6   :  { %1460 = vmatpush.msrb.mxu1 %v1446_v28 }
 0x5f8   :  { %1461 = vmatpush.msrb.mxu1 %v1445_v30 }
 0x5fa   :  { %1462 = vmatpush.msrb.mxu1 %v1444_v31 }
 0x5fc   :  { %1463 = vmatpush.msrb.mxu1 %v1443_v33 }
 0x5fe   :  { %1464 = vmatpush.msrb.mxu1 %v1442_v34 }
 0x600   :  { %1465 = vmatpush.msrb.mxu1 %v1441_v36 }
 0x602   :  { %1466 = vmatpush.msrb.mxu1 %v1440_v37 }
 0x604   :  { %1467 = vmatpush.msrb.mxu1 %v1439_v54 }
 0x606   :  { %1468 = vmatpush.msrb.mxu1 %v1438_v57 }
 0x608   :  { %1469 = vmatpush.msrb.mxu1 %v1437_v62 }
 0x64f   :  { %v1156_v46 = vpop.f32.mrf.mxu0 }
 0x650   :  { %1551 = vmatmul.msk.f32.vlgmr.msrb.gmra.mxu0 %vm389_vm5, %v1156_v46 }
 0x659   :  { %v1346_v51 = vpop.xlane.xlu1 %1345 }
 0x65a   :  { %v1350_v0 = vmul.f32 %v1346_v51, %v1687_v8 }
 0x65c   :  { %v1352_v53 = vadd.f32 1e-05, %v1350_v0 }
 0x65e   :  { %1601 = vrsqrt.f32 %v1352_v53  ;;  %vm1360_vm11 = vweird.f32 %v1352_v53 }
 0x663   :  { %v1225_v9 = vpop.f32.mrf.mxu3 }
 0x664   :  { %v1602_v35 = vpop.eup %1601  ;;  %v1202_v48 = vpop.f32.mrf.mxu2  ;;  %1554 = vmatmul.msk.f32.vlgmr.msra.gmra.mxu3 %vm389_vm5, %v1225_v9 }
 0x665   :  { %v1355_v10 = vmul.f32 %v1602_v35, %v1352_v53  ;;  %1553 = vmatmul.msk.f32.vlgmr.msrb.gmra.mxu2 %vm389_vm5, %v1202_v48  ;;  %vm1361_vm10 = vweird.f32 %v1602_v35 }
 0x666   :  { %v1179_v42 = vpop.f32.mrf.mxu1  ;;  %vm1362_vm12 = vmor %vm1360_vm11, %vm1361_vm10 }
 0x667   :  { %v1356_v52 = vmul.f32 %v1602_v35, %v1355_v10  ;;  %1552 = vmatmul.msk.f32.vlgmr.msra.gmra.mxu1 %vm389_vm5, %v1179_v42 }
 0x669   :  { %v1357_v14 = vmul.f32 0.5, %v1356_v52 }
 0x66b   :  { %v1358_v11 = vsub.f32 1.5, %v1357_v14 }
 0x66d   :  { %v1359_v17 = vmul.f32 %v1602_v35, %v1358_v11 }
 0x66f   :  { %v1363_v18 = vsel %vm1362_vm12, %v1602_v35, %v1359_v17  ;;  %v1453_v35 = vperm.slane %v1844_v45, 5 }
 0x670   :  { %v1374_v20 = vmul.f32 %v1363_v18, %v1340_v13 }
 0x672   :  { %v1377_v16 = vmul.f32 %v1376_v15, %v1374_v20 }
 0x674   :  { %v1380_v19 = vadd.f32 %v1379_v21, %v1377_v16 }
 0x676   :  { %1555 = vmatmul.msk.f32.vlgmr.msra.gmra.mxu0 %vm30_vm0, %v1380_v19 }
 0x6cd   :  { %v1248_v38 = vpop.f32.mrf.mxu0 }
 0x6ce   :  { %v1320_v58 = vsel %vm30_vm0, %v1248_v38, 0.0 }
 0x6e4   :  { %v1271_v40 = vpop.f32.mrf.mxu1 }
 0x6e5   :  { %v1321_v56 = vsel %vm30_vm0, %v1271_v40, 0.0 }
 0x6e6   :  { %v1322_v59 = vadd.f32 %v1321_v56, %v1320_v58 }
 0x6e7   :  { %v1317_v61 = vpop.f32.mrf.mxu3 }
 0x6e8   :  { %v1294_v60 = vpop.f32.mrf.mxu2  ;;  %v1325_v3 = vsel %vm30_vm0, %v1317_v61, 0.0 }
 0x6e9   :  { %v1323_v63 = vsel %vm30_vm0, %v1294_v60, 0.0 }
 0x6ea   :  { %v1324_v2 = vadd.f32 %v1323_v63, %v1322_v59 }
 0x6ec   :  { %v1326_v4 = vadd.f32 %v1325_v3, %v1324_v2 }
 0x6ee   :  { %v1329_v5 = vadd.f32 %v1327_v29, %v1326_v4 }
 0x6f0   :  { %v2268_v6 = vadd.f32 %v1329_v5, %v2034_v1 }
 0x6f2   :  { %v1335_v12 = vsel %vm30_vm0, %v2268_v6, 0.0 }
 0x6f3   :  { %1336 = vadd.xlane.f32.xlu0 %v1335_v12  ;;  %v1413_v13 = vpop.f32.mrf.mxu0 }
 0x6f4   :  { %v1414_v32 = vadd.f32 %v1562_v7, %v1413_v13 }
 0x6f6   :  { %v1421_v47 = vmul.f32 0.044715, %v1414_v32  ;;  %v1419_v41 = vmul.f32 0.5, %v1414_v32 }
 0x6f8   :  { %v1423_v49 = vmul.f32 %v1421_v47, %v1414_v32 }
 0x6fa   :  { %v1425_v39 = vmul.f32 %v1423_v49, %v1414_v32 }
 0x6fc   :  { %v1427_v43 = vadd.f32 %v1425_v39, %v1414_v32 }
 0x6fe   :  { %v1429_v46 = vmul.f32 0.7978846, %v1427_v43 }
 0x700   :  { %1603 = vtanh.f32 %v1429_v46 }
 0x706   :  { %v1604_v29 = vpop.eup %1603 }
 0x707   :  { %v1433_v1 = vadd.f32 1.0, %v1604_v29 }
 0x709   :  { %v1435_v50 = vmul.f32 %v1433_v1, %v1419_v41 }
 0x70b   :  { %1470 = vmatmul.f32.vlgmr.msrb.gmra.mxu1 %v1435_v50 }
 0x766   :  { %v1337_v44 = vpop.xlane.xlu0 %1336 }
 0x767   :  { %v1339_v51 = vmul.f32 %v1337_v44, %v1687_v8 }
 0x769   :  { %v1341_v0 = vsub.f32 %v2268_v6, %v1339_v51 }
 0x76b   :  { %v1343_v53 = vmul.f32 %v1341_v0, %v1341_v0 }
 0x76d   :  { %v1347_v9 = vsel %vm30_vm0, %v1343_v53, 0.0 }
 0x76e   :  { %1348 = vadd.xlane.f32.xlu2 %v1347_v9 }
 0x788   :  { %v1471_v48 = vpop.f32.mrf.mxu1 }
 0x789   :  { %v1472_v10 = vadd.f32 %v1471_v48, %v1453_v35 }
 0x78b   :  { %v1477_v42 = vadd.f32 %v1472_v10, %v2177_v55 }
 0x78d   :  { %1479 = vst.msk [vmem:[#allocation2] sm:$0xff] %vm30_vm0, %v1477_v42 }
 0x7e1   :  { %v1349_v52 = vpop.xlane.xlu2 %1348 }
 0x7e2   :  { %v1351_v14 = vmul.f32 %v1349_v52, %v1687_v8 }
 0x7e4   :  { %v1353_v11 = vadd.f32 1e-05, %v1351_v14 }
 0x7e6   :  { %1605 = vrsqrt.f32 %v1353_v11  ;;  %vm1370_vm14 = vweird.f32 %v1353_v11 }
 0x7ec   :  { %v1606_v17 = vpop.eup %1605 }
 0x7ed   :  { %v1365_v18 = vmul.f32 %v1606_v17, %v1353_v11  ;;  %vm1371_vm13 = vweird.f32 %v1606_v17 }
 0x7ee   :  { %vm1372_vm15 = vmor %vm1370_vm14, %vm1371_vm13 }
 0x7ef   :  { %v1366_v20 = vmul.f32 %v1606_v17, %v1365_v18 }
 0x7f1   :  { %v1367_v16 = vmul.f32 0.5, %v1366_v20 }
 0x7f3   :  { %v1368_v19 = vsub.f32 1.5, %v1367_v16 }
 0x7f5   :  { %v1369_v22 = vmul.f32 %v1606_v17, %v1368_v19 }
 0x7f7   :  { %v1373_v23 = vsel %vm1372_vm15, %v1606_v17, %v1369_v22 }
 0x7f8   :  { %v1375_v24 = vmul.f32 %v1373_v23, %v1341_v0 }
 0x7fa   :  { %v1378_v55 = vmul.f32 %v1376_v15, %v1375_v24 }
 0x7fc   :  { %v1381_v25 = vadd.f32 %v1379_v21, %v1378_v55 }
 0x7fe   :  { %1556 = vmatmul.msk.f32.gmra.mxu0 %vm30_vm0, %v1381_v25 }
 0x87b   :  { %v1416_v8 = vpop.f32.mrf.mxu0 }
 0x87c   :  { %v1417_v26 = vadd.f32 %v1562_v7, %v1416_v8 }
 0x87e   :  { %v1422_v27 = vmul.f32 0.044715, %v1417_v26  ;;  %v1420_v36 = vmul.f32 0.5, %v1417_v26 }
 0x880   :  { %v1424_v28 = vmul.f32 %v1422_v27, %v1417_v26 }
 0x882   :  { %v1426_v30 = vmul.f32 %v1424_v28, %v1417_v26 }
 0x884   :  { %v1428_v31 = vadd.f32 %v1426_v30, %v1417_v26 }
 0x886   :  { %v1430_v33 = vmul.f32 0.7978846, %v1428_v31 }
 0x888   :  { %1607 = vtanh.f32 %v1430_v33 }
 0x88e   :  { %v1608_v34 = vpop.eup %1607 }
 0x88f   :  { %v1434_v37 = vadd.f32 1.0, %v1608_v34 }
 0x891   :  { %v1436_v38 = vmul.f32 %v1434_v37, %v1420_v36 }
 0x893   :  { %1473 = vmatmul.f32.gmra.mxu1 %v1436_v38 }
 0x910   :  { %v1474_v45 = vpop.f32.mrf.mxu1 }
 0x911   :  { %v1475_v15 = vadd.f32 %v1474_v45, %v1453_v35 }
 0x913   :  { %v1478_v21 = vadd.f32 %v1475_v15, %v2268_v6 }
 0x915   :  { %1480 = vst.msk [vmem:[#allocation2 + $0x8] sm:$0xff] %vm30_vm0, %v1478_v21 }
 0x916   :  { %1493 = dma.vmem_to_hbm [thread:$0]  %s1486_s5, 256, %s1488_s28, [#allocation3], %s1638_s29, %s1638_s29, %s1639_s1  }
 0x917   :  { %1633 = dma.done.wait [#allocation3], 256  }
 0x918   :  { %1634 = vsyncadd [#allocation3], 4294967040 }
 0x919   :  { %1498 = vsyncpa [#allocation3], 1 }

</bundles_post_ra>
